<compile_context>
chip_gen: v7x
topology: tpu7x:2x2x1
jax: 0.10.0
libtpu: 0.0.40
codegen_flags: <defaults>
</compile_context>

<pallas_src>
import jax
import jax.numpy as jnp
from jax.experimental import pallas as pl
from jax.experimental.pallas import tpu as pltpu

_LANE = 128
_SUBLANE = 8


def _round_up(x, m):
    return ((x + m - 1) // m) * m


def _cdiv(a, b):
    return -(-a // b)


def mlp_kernel(x_ref, w1_ref, b1_ref, w2_ref, b2_ref, o_ref):
    # x arrives in its native dtype (f32 or bf16) and is cast to bf16 here,
    # avoiding a separate padded-copy XLA op in the wrapper.
    x = x_ref[...].astype(jnp.bfloat16)
    # Linear 1: bf16 operands on the MXU, f32 accumulate; bias + ReLU in f32.
    h = jnp.dot(x, w1_ref[...], preferred_element_type=jnp.float32)
    h = jnp.maximum(h + b1_ref[...], 0.0)
    # Linear 2: cast activations to bf16 for the MXU, accumulate in f32.
    y = jnp.dot(h.astype(jnp.bfloat16), w2_ref[...],
                preferred_element_type=jnp.float32)
    o_ref[...] = jnp.maximum(y + b2_ref[...], 0.0).astype(o_ref.dtype)


def prepare_params(w1, b1, w2, b2):
    """One-time prep: transpose, zero-pad N-dims to lane multiples, cast to bf16.

    w1: (hidden, input_features)  b1: (hidden,)   -- PyTorch Linear layout
    w2: (output, hidden)          b2: (output,)
    K (=input_features) is intentionally NOT padded; Mosaic lane-pads in VMEM.
    """
    hid, in_f = w1.shape
    out_f = w2.shape[0]
    hid_p = _round_up(hid, _LANE)
    out_p = _round_up(out_f, _LANE)

    w1_t = jnp.zeros((in_f, hid_p), jnp.float32).at[:, :hid].set(w1.T)
    w2_t = jnp.zeros((hid_p, out_p), jnp.float32).at[:hid, :out_f].set(w2.T)
    b1_p = jnp.zeros((1, hid_p), jnp.float32).at[0, :hid].set(b1)
    b2_p = jnp.zeros((1, out_p), jnp.float32).at[0, :out_f].set(b2)
    return {
        "w1": w1_t.astype(jnp.bfloat16),   # (in_f, hid_p)
        "b1": b1_p,                        # (1, hid_p) f32
        "w2": w2_t.astype(jnp.bfloat16),   # (hid_p, out_p)
        "b2": b2_p,                        # (1, out_p) f32
        "in_f": in_f,
        "out_f": out_f,
    }


def fashion_mnist_model_v1(x_nchw, params, *, tile_n=2048):
    """Forward: Flatten -> Linear -> ReLU -> Linear -> ReLU.  Returns (N, out)."""
    w1, b1, w2, b2 = params["w1"], params["b1"], params["w2"], params["b2"]
    in_f, out_f = params["in_f"], params["out_f"]
    out_p = w2.shape[1]

    n = x_nchw.shape[0]
    x_flat = x_nchw.reshape(n, -1)          # nn.Flatten on NCHW (no pad/cast copy)
    assert x_flat.shape[1] == in_f

    # Pad batch only to a sublane multiple (<= 7 extra rows), never to tile_n.
    n_p = _round_up(n, _SUBLANE)
    if n_p != n:
        x_flat = jnp.pad(x_flat, ((0, n_p - n), (0, 0)))

    # Batch tile: sublane-aligned, >= 2 grid steps when there is enough work
    # (so v7x shards across both TensorCores), capped at tile_n for VMEM.
    tn = max(_SUBLANE, min(tile_n, _round_up(_cdiv(n_p, 2), _SUBLANE)))
    grid_n = _cdiv(n_p, tn)                 # ragged last tile is masked

    # Explicit scoped-VMEM limit: v5e defaults to only 16 MiB; keep the cap
    # well under v7x's 64 MiB physical VMEM.
    x_tile_b = 2 * tn * _round_up(in_f, _LANE) * x_flat.dtype.itemsize
    o_tile_b = 2 * tn * out_p * 2                       # bf16 out, double-buffered
    w_b = 2 * (w1.size + w2.size) + 4 * (b1.size + b2.size)
    vmem_limit = int(min(56 << 20,
                         max(32 << 20, x_tile_b + o_tile_b + w_b + (8 << 20))))

    out = pl.pallas_call(
        mlp_kernel,
        out_shape=jax.ShapeDtypeStruct((n_p, out_p), jnp.bfloat16),
        grid=(grid_n,),
        in_specs=[
            pl.BlockSpec((tn, in_f), lambda i: (i, 0)),   # x: streams per tile
            pl.BlockSpec(w1.shape, lambda i: (0, 0)),     # w1: VMEM-resident
            pl.BlockSpec(b1.shape, lambda i: (0, 0)),     # b1: VMEM-resident
            pl.BlockSpec(w2.shape, lambda i: (0, 0)),     # w2: VMEM-resident
            pl.BlockSpec(b2.shape, lambda i: (0, 0)),     # b2: VMEM-resident
        ],
        out_specs=pl.BlockSpec((tn, out_p), lambda i: (i, 0)),
        compiler_params=pltpu.CompilerParams(
            dimension_semantics=("parallel",),
            vmem_limit_bytes=vmem_limit),
    )(x_flat, w1, b1, w2, b2)

    # Drop batch / lane padding (padded output columns are exactly zero).
    return out[:n, :out_f]


def _init_linear(key, out_features, in_features):
    """torch.nn.Linear default init: U(-1/sqrt(fan_in), 1/sqrt(fan_in))."""
    kw, kb = jax.random.split(key)
    bound = 1.0 / jnp.sqrt(jnp.float32(in_features))
    w = jax.random.uniform(kw, (out_features, in_features), jnp.float32, -bound, bound)
    b = jax.random.uniform(kb, (out_features,), jnp.float32, -bound, bound)
    return w, b


if __name__ == "__main__":
    key = jax.random.PRNGKey(0)
    k_x, k_l1, k_l2 = jax.random.split(key, 3)

    # FashionMNIST-like small shapes: batch=16 (2 grid steps), 1x28x28,
    # hidden=32, out=10.
    N, C, H, W = 16, 1, 28, 28
    input_shape = C * H * W
    hidden_units = 32
    output_shape = 10

    x = jax.random.normal(k_x, (N, C, H, W), jnp.float32)
    w1, b1 = _init_linear(k_l1, hidden_units, input_shape)
    w2, b2 = _init_linear(k_l2, output_shape, hidden_units)

    params = prepare_params(w1, b1, w2, b2)          # one-time, outside hot path
    out = fashion_mnist_model_v1(x, params)
    out = jax.block_until_ready(out)

    # Reference in plain f32 JAX (same math as the PyTorch module).
    x_flat = x.reshape(N, -1)
    ref = jnp.maximum(x_flat @ w1.T + b1, 0.0)
    ref = jnp.maximum(ref @ w2.T + b2, 0.0)

    assert out.shape == (N, output_shape)
    # bf16 matmul operands + bf16 output (f32 accumulation) vs f32 reference.
    err = jnp.max(jnp.abs(out.astype(jnp.float32) - ref))
    assert jnp.allclose(out.astype(jnp.float32), ref, atol=3e-2, rtol=3e-2), \
        f"max abs err {err}"

    print("KERNEL_OK")
</pallas_src>

<mosaic_0001>
module attributes {stable_mosaic.version = 11 : i64} {
  func.func @mlp_kernel(%arg0: i32, %arg1: memref<8x784xf32, #tpu.memory_space<vmem>>, %arg2: memref<784x128xbf16, #tpu.memory_space<vmem>>, %arg3: memref<1x128xf32, #tpu.memory_space<vmem>>, %arg4: memref<128x128xbf16, #tpu.memory_space<vmem>>, %arg5: memref<1x128xf32, #tpu.memory_space<vmem>>, %arg6: memref<8x128xbf16, #tpu.memory_space<vmem>>) attributes {dimension_semantics = [#tpu.dimension_semantics<parallel>], iteration_bounds = array<i64: 2>, scalar_prefetch = 0 : i64, scratch_operands = 0 : i64, tpu.core_type = #tpu.core_type<tc>, window_params = [{transform_indices = @transform_0, window_bounds = array<i64: 8, 784>}, {pipeline_mode = #tpu.pipeline_mode<synchronous>, transform_indices = @transform_1, window_bounds = array<i64: 784, 128>}, {pipeline_mode = #tpu.pipeline_mode<synchronous>, transform_indices = @transform_2, window_bounds = array<i64: 1, 128>}, {pipeline_mode = #tpu.pipeline_mode<synchronous>, transform_indices = @transform_3, window_bounds = array<i64: 128, 128>}, {pipeline_mode = #tpu.pipeline_mode<synchronous>, transform_indices = @transform_4, window_bounds = array<i64: 1, 128>}, {transform_indices = @transform_5, window_bounds = array<i64: 8, 128>}]} {
    %c0 = arith.constant 0 : index
    %c0_0 = arith.constant 0 : index
    %0 = vector.load %arg1[%c0, %c0_0] : memref<8x784xf32, #tpu.memory_space<vmem>>, vector<8x784xf32>
    %1 = arith.truncf %0 : vector<8x784xf32> to vector<8x784xbf16>
    %c0_1 = arith.constant 0 : index
    %c0_2 = arith.constant 0 : index
    %2 = vector.load %arg2[%c0_1, %c0_2] : memref<784x128xbf16, #tpu.memory_space<vmem>>, vector<784x128xbf16>
    %cst = arith.constant dense<0.000000e+00> : vector<8x128xf32>
    %3 = tpu.matmul %1, %2, %cst {dimension_numbers = #tpu.dot_dimension_numbers<[1], [0], [0], [1], [0, 0, 1, 1], [], []>} : vector<8x784xbf16>, vector<784x128xbf16>, vector<8x128xf32> -> vector<8x128xf32>
    %c0_3 = arith.constant 0 : index
    %c0_4 = arith.constant 0 : index
    %4 = vector.load %arg3[%c0_3, %c0_4] : memref<1x128xf32, #tpu.memory_space<vmem>>, vector<1x128xf32>
    %5 = vector.broadcast %4 : vector<1x128xf32> to vector<8x128xf32>
    %6 = arith.addf %3, %5 : vector<8x128xf32>
    %cst_5 = arith.constant 0.000000e+00 : f32
    %7 = vector.broadcast %cst_5 : f32 to vector<8x128xf32>
    %8 = arith.maximumf %6, %7 : vector<8x128xf32>
    %9 = arith.truncf %8 : vector<8x128xf32> to vector<8x128xbf16>
    %c0_6 = arith.constant 0 : index
    %c0_7 = arith.constant 0 : index
    %10 = vector.load %arg4[%c0_6, %c0_7] : memref<128x128xbf16, #tpu.memory_space<vmem>>, vector<128x128xbf16>
    %cst_8 = arith.constant dense<0.000000e+00> : vector<8x128xf32>
    %11 = tpu.matmul %9, %10, %cst_8 {dimension_numbers = #tpu.dot_dimension_numbers<[1], [0], [0], [1], [0, 0, 1, 1], [], []>} : vector<8x128xbf16>, vector<128x128xbf16>, vector<8x128xf32> -> vector<8x128xf32>
    %c0_9 = arith.constant 0 : index
    %c0_10 = arith.constant 0 : index
    %12 = vector.load %arg5[%c0_9, %c0_10] : memref<1x128xf32, #tpu.memory_space<vmem>>, vector<1x128xf32>
    %13 = vector.broadcast %12 : vector<1x128xf32> to vector<8x128xf32>
    %14 = arith.addf %11, %13 : vector<8x128xf32>
    %cst_11 = arith.constant 0.000000e+00 : f32
    %15 = vector.broadcast %cst_11 : f32 to vector<8x128xf32>
    %16 = arith.maximumf %14, %15 : vector<8x128xf32>
    %17 = arith.truncf %16 : vector<8x128xf32> to vector<8x128xbf16>
    %c0_12 = arith.constant 0 : index
    %c0_13 = arith.constant 0 : index
    %18 = vector.load %arg6[%c0_12, %c0_13] : memref<8x128xbf16, #tpu.memory_space<vmem>>, vector<8x128xbf16>
    tpu.vector_store %arg6[%c0_12, %c0_13], %17 {strides = array<i32>} : memref<8x128xbf16, #tpu.memory_space<vmem>>, vector<8x128xbf16>,
    return
  }
  func.func @transform_0(%arg0: i32) -> (i32, i32) {
    %c0_i32 = arith.constant 0 : i32
    %c0_i32_0 = arith.constant 0 : i32
    return %arg0, %c0_i32 : i32, i32
  }
  func.func @transform_1(%arg0: i32) -> (i32, i32) {
    %c0_i32 = arith.constant 0 : i32
    %c0_i32_0 = arith.constant 0 : i32
    %c0_i32_1 = arith.constant 0 : i32
    return %c0_i32, %c0_i32_0 : i32, i32
  }
  func.func @transform_2(%arg0: i32) -> (i32, i32) {
    %c0_i32 = arith.constant 0 : i32
    %c0_i32_0 = arith.constant 0 : i32
    %c0_i32_1 = arith.constant 0 : i32
    return %c0_i32, %c0_i32_0 : i32, i32
  }
  func.func @transform_3(%arg0: i32) -> (i32, i32) {
    %c0_i32 = arith.constant 0 : i32
    %c0_i32_0 = arith.constant 0 : i32
    %c0_i32_1 = arith.constant 0 : i32
    return %c0_i32, %c0_i32_0 : i32, i32
  }
  func.func @transform_4(%arg0: i32) -> (i32, i32) {
    %c0_i32 = arith.constant 0 : i32
    %c0_i32_0 = arith.constant 0 : i32
    %c0_i32_1 = arith.constant 0 : i32
    return %c0_i32, %c0_i32_0 : i32, i32
  }
  func.func @transform_5(%arg0: i32) -> (i32, i32) {
    %c0_i32 = arith.constant 0 : i32
    %c0_i32_0 = arith.constant 0 : i32
    return %arg0, %c0_i32 : i32, i32
  }
}

</mosaic_0001>

<bundles_post_ra>
// kernel: tpu_custom_call.1
= control target key start
LH: loop header
LB: loop body
LE: loop exit
PB: predicated region body
PF: predicated region fallthrough
CT: control target
= control target key end

     0   :  { %10 = vsyncpa [#allocation3], 0  ;;  %s1829_s0 = inlined_call_operand.hbm [shape: f32[16,784], index: 0, kind: input, shape index: {}]   ;;  %s1830_s1 = inlined_call_operand.hbm [shape: bf16[784,128], index: 1, kind: input, shape index: {}]   ;;  %s1831_s2 = inlined_call_operand.vmem [shape: f32[1,128], index: 2, kind: input, shape index: {}]   ;;  %s1832_s3 = inlined_call_operand.hbm [shape: bf16[128,128], index: 3, kind: input, shape index: {}]   ;;  %s1833_s4 = inlined_call_operand.vmem [shape: f32[1,128], index: 4, kind: input, shape index: {}]   ;;  %s1834_s5 = inlined_call_operand.hbm [shape: bf16[16,128], index: 5, kind: output, shape index: {}]  }
   0x1   :  { %12 = vsyncpa [#allocation3 + $0x1], 0 }
   0x2   :  { %13 = vsyncpa [#allocation6], 0 }
   0x3   :  { %14 = vsyncpa [#allocation4], 0 }
   0x4   :  { %16 = vsyncpa [#allocation4 + $0x1], 0  ;;  %s1571_s18 = smov 0   ;;  %s1573_s19 = smov 0  }
   0x5   :  { %s1575_s20 = smov 0   ;;  %s1577_s21 = smov 0  }
   0x6 LB: > { %s1592_s22 = sadd.s32 4294967295, %s1531_s21   ;;  %s1067_s23 = sadd.s32 4294967294, %s1531_s21   ;;  %s1531_s21 = sphi %s1577_s21, %s1854_s21   ;;  %s1527_s20 = sphi %s1575_s20, %s1853_s20   ;;  %s1523_s19 = sphi %s1573_s19, %s1852_s19   ;;  %s1519_s18 = sphi %s1571_s18, %s1851_s18  }
   0x7   : > { %p42_p0 = scmp.ne.s32.totalorder %s1523_s19, %s1519_s18  ;;  %p1835_p1 = scmp.eq.s32.totalorder %s1592_s22, 0 }
   0x8   : > { %p156_p3 = scmp.eq.s32.totalorder %s1067_s23, 1  ;;  %p1068_p5 = scmp.ge.s32.totalorder %s1531_s21, 1 }
   0x9   : > { %p1601_p4 = por %p1835_p1, %p42_p0  ;;  %p163_p7 = scmp.lt.s32.totalorder %s1531_s21, 3 }
   0xa   : > { %p1606_p6 = por %p156_p3, %p42_p0  ;;  %s1533_s27 = smov [#allocation5]  }
   0xb   : > { %s1838_s24 = scalar_select %p1601_p4, 1, 0 }
   0xc   : > { %s1839_s25 = scalar_select %p1606_p6, 1, 0 }
   0xd   : > { %p1611_p8 = pnand %p1068_p5, %p163_p7  ;;  %s175_s28 = sshll.u32 %s1533_s27, 4  ;;  %s1615_s28 = int_to_ptr.vmem [resolvable:$true] %s175_s28 }
   0xe   : > { %s1534_s30 = smov [#allocation7]   ;;  %s1375_s9 = scalar_lea.hbm %s1830_s1, 6272 }
   0xf   : > { %p1259_p9 = pneg %p1611_p8  ;;  %s191_s6 = sshll.u32 %s1534_s30, 4  ;;  %s1626_s6 = int_to_ptr.vmem [resolvable:$true] %s191_s6 }
  0x10   : > { %p1376_p12 = scmp.ne.s32.totalorder %s1830_s1, %s1375_s9  ;;  %p1382_p5 = scmp.lt.u32.totalorder %s1375_s9, %s1830_s1 }
  0x11   : > { %p1622_p11 = pnand %p1259_p9, %p1835_p1 }
  0x13   : > { %p1377_p13 = pneg %p1622_p11 }
  0x15   : > { %p1378_p0 = pnand %p1377_p13, %p1376_p12 }
  0x17   : > { %p1379_p3 = pneg %p1378_p0 }
  0x19   : > { %p1384_p7 = pnand %p1382_p5, %p1379_p3 }
  0x1b   : > { %1387 = shalt.err (!%p1384_p7)
}
  0x1c   : > { %s1388_s14 = scalar_lea.vmem %s1615_s28, 6272  ;;  %p1396_p2 = scmp.lt.s32.totalorder %s1615_s28, %s1615_s28 }
  0x1d   : > { %p1389_p9 = scmp.ne.s32.totalorder %s1615_s28, %s1388_s14  ;;  %p1397_p12 = scmp.lt.s32.totalorder %s1388_s14, %s1388_s14 }
  0x1f   : > { %p1391_p10 = pnand %p1389_p9, %p1377_p13  ;;  %p1398_p0 = por %p1397_p12, %p1396_p2 }
  0x21   : > { %p1392_p1 = pneg %p1391_p10 }
  0x23   : > { %p1399_p6 = pnand %p1398_p0, %p1392_p1 }
  0x25   : > { %1402 = shalt.err (!%p1399_p6)
}
  0x26   : > { %s1535_s15 = smov 64   ;;  %s1536_s16 = smov 4  }
  0x27   : > { %1262 = dma.hbm_to_vmem [thread:$0]  (!%p1622_p11), %s1830_s1, 6272, %s1615_s28, [#allocation6], %s1535_s15, %s1535_s15, %s1536_s16  }
  0x28   : > { %s1403_s7 = scalar_lea.hbm %s1832_s3, 1024 }
  0x29   : > { %p1404_p2 = scmp.ne.s32.totalorder %s1832_s3, %s1403_s7  ;;  %p1410_p10 = scmp.lt.u32.totalorder %s1403_s7, %s1832_s3 }
  0x2b   : > { %p1406_p1 = pnand %p1404_p2, %p1377_p13 }
  0x2d   : > { %p1407_p6 = pneg %p1406_p1 }
  0x2f   : > { %p1412_p3 = pnand %p1410_p10, %p1407_p6 }
  0x31   : > { %1415 = shalt.err (!%p1412_p3)
}
  0x32   : > { %s1416_s28 = scalar_lea.vmem %s1626_s6, 1024  ;;  %p1424_p12 = scmp.lt.s32.totalorder %s1626_s6, %s1626_s6 }
  0x33   : > { %p1417_p5 = scmp.ne.s32.totalorder %s1626_s6, %s1416_s28  ;;  %p1425_p0 = scmp.lt.s32.totalorder %s1416_s28, %s1416_s28 }
  0x35   : > { %p1419_p7 = pnand %p1417_p5, %p1377_p13  ;;  %p1426_p2 = por %p1425_p0, %p1424_p12 }
  0x37   : > { %p1420_p9 = pneg %p1419_p7 }
  0x39   : > { %p1427_p1 = pnand %p1426_p2, %p1420_p9 }
  0x3b   : > { %1430 = shalt.err (!%p1427_p1)
}
  0x3c   : > { %1265 = dma.hbm_to_vmem [thread:$0]  (!%p1622_p11), %s1832_s3, 1024, %s1626_s6, [#allocation6], %s1535_s15, %s1535_s15, %s1536_s16  }
  0x3d   : > { %s1681_s14 = sadd.s32 1, %s1531_s21   ;;  %s29_s29 = sadd.s32 1, %s1527_s20 }
  0x3e   : > { %s26_s17 = ssub.s32 %s1531_s21, %s1681_s14  ;;  %p36_p13 = scmp.ne.s32.totalorder %s1527_s20, %s1523_s19 }
  0x3f   : > { %p27_p6 = scmp.eq.s32.totalorder %s26_s17, 0  ;;  %p37_p10 = scmp.eq.s32.totalorder %s1531_s21, 0 }
  0x40   : > { %p1842_p3 = scmp.eq.s32.totalorder %s1592_s22, 1  ;;  %p1276_p7 = scmp.lt.s32.totalorder %s1531_s21, 2 }
  0x41   : > { %s1697_s27 = scalar_select %p27_p6, %s1527_s20, %s29_s29  }
  0x42   : > { %p1691_p5 = por %p1842_p3, %p36_p13  ;;  %p38_p9 = por %p37_p10, %p36_p13 }
  0x43   : > { %s208_s30 = sand.u32 1, %s1527_s20   ;;  %s1245_s6 = smul.u32 896, %s1531_s21 }
  0x44   : > { %s1843_s23 = scalar_select %p1691_p5, 1, 0 }
  0x45   : > { %s1244_s7 = smul.u32 56, %s208_s30  ;;  %p1701_p11 = pnand %p1276_p7, %p38_p9 }
  0x46   : > { %s1708_s9 = scalar_lea.hbm %s1829_s0, %s1245_s6  ;;  %s209_s28 = scalar_lea.sflag [#allocation3], %s208_s30 }
  0x47   : > { %s212_s10 = scalar_lea.vmem [#allocation2], %s1244_s7  ;;  %s1431_s12 = scalar_lea.hbm %s1708_s9, 896 }
  0x48   : > { %s220_s11 = sshll.u32 %s212_s10, 4  ;;  %p1432_p12 = scmp.ne.s32.totalorder %s1708_s9, %s1431_s12  ;;  %s1710_s11 = int_to_ptr.vmem [resolvable:$true] %s220_s11 }
  0x49   : > { %p1433_p0 = pneg %p1701_p11  ;;  %s1436_s17 = scalar_lea.hbm %s1829_s0, 1792 }
  0x4a   : > { %p1437_p13 = scmp.lt.u32.totalorder %s1708_s9, %s1829_s0  ;;  %p1438_p6 = scmp.lt.u32.totalorder %s1436_s17, %s1431_s12 }
  0x4b   : > { %p1434_p2 = pnand %p1433_p0, %p1432_p12  ;;  %p1440_p3 = scmp.lt.u32.totalorder %s1431_s12, %s1708_s9 }
  0x4c   : > { %p1439_p10 = por %p1438_p6, %p1437_p13 }
  0x4d   : > { %p1435_p1 = pneg %p1434_p2 }
  0x4e   : > { %p1441_p7 = por %p1440_p3, %p1439_p10 }
  0x50   : > { %p1442_p9 = pnand %p1441_p7, %p1435_p1 }
  0x52   : > { %1445 = shalt.err (!%p1442_p9)
}
  0x53   : > { %s1446_s30 = scalar_lea.vmem %s1710_s11, 896  ;;  %s1537_s7 = smov [#allocation2]  }
  0x54   : > { %p1447_p12 = scmp.ne.s32.totalorder %s1710_s11, %s1446_s30  ;;  %s1451_s8 = sshll.u32 %s1537_s7, 4  ;;  %s1452_s8 = int_to_ptr.vmem [resolvable:$false] %s1451_s8 }
  0x55   : > { %s1453_s10 = scalar_lea.vmem %s1452_s8, 1792  ;;  %p1454_p4 = scmp.lt.s32.totalorder %s1710_s11, %s1452_s8 }
  0x56   : > { %p1449_p2 = pnand %p1447_p12, %p1433_p0  ;;  %p1455_p13 = scmp.lt.s32.totalorder %s1453_s10, %s1446_s30 }
  0x58   : > { %p1450_p5 = pneg %p1449_p2  ;;  %p1456_p6 = por %p1455_p13, %p1454_p4 }
  0x5a   : > { %p1457_p10 = pnand %p1456_p6, %p1450_p5 }
  0x5c   : > { %1460 = shalt.err (!%p1457_p10)
}
  0x5d   : > { %1269 = dma.hbm_to_vmem [thread:$0]  (!%p1701_p11), %s1708_s9, 896, %s1710_s11, %s209_s28  }
  0x5e   : > { %229 = sbr.rel (%p1611_p8) target bundleno = 625 (0x271), region = 40  ;;  %s1740_s12 = sand.u32 (!%p1611_p8), 1, %s1523_s19  }
  0x5f   : > { %s1246_s13 = smul.u32 (!%p1611_p8), 56, %s1740_s12  ;;  %s232_s29 = scalar_lea.sflag (!%p1611_p8), [#allocation3], %s1740_s12 }
  0x60   : > { %p1845_p4 = scmp.ne.s32.totalorder (!%p1611_p8), %s1838_s24, 0 }
  0x61   : > { %s1744_s17 = scalar_lea.vmem (!%p1611_p8), [#allocation2], %s1246_s13 }
  0x65   : > { %1506 = dma.done.wait (%p1845_p4), %s232_s29, 896  }
  0x66   : > { %1508 = vsyncadd (%p1845_p4), %s232_s29, 4294966400  ;;  %p1846_p5 = scmp.eq.s32.totalorder %s1592_s22, 0 }
  0x68   : > { %1510 = dma.done.wait (%p1846_p5), [#allocation6], 7296   ;;  %p1847_p8 = pmov %p1846_p5 }
  0x69   : > { %v1318_v0 = vld [vmem:[#allocation5 + $0x40] sm:$0xff]   ;;  %v1322_v4 = vld [vmem:[#allocation5 + $0x48] sm:$0xff]   ;;  %v1326_v8 = vld [vmem:[#allocation5 + $0x50] sm:$0xff]   ;;  %v1538_v44 = vmov 0.0   ;;  %vm1539_vm0 = vmmov 0   ;;  %vm684_vm1 = vcmask 130048  }
  0x6a   : > { %1512 = vsyncadd (%p1847_p8), [#allocation6], 4294960000  ;;  %v1319_v1 = vld [vmem:[#allocation5] sm:$0xff]   ;;  %1141 = vmatprep.subr.bf16.mxu0 %v1318_v0  ;;  %v1323_v5 = vld [vmem:[#allocation5 + $0x8] sm:$0xff]   ;;  %s1076_s15 = sshll.u32 %s1740_s12, 2  ;;  %s1138_s28 = sshll.u32 %s1592_s22, 6 }
  0x6b   : > { %v1320_v2 = vld [vmem:[#allocation5 + $0xc0] sm:$0xff]   ;;  %1142 = vmatpush3.bf16.msra.mxu0 %v1319_v1  ;;  %v1324_v6 = vld [vmem:[#allocation5 + $0xc8] sm:$0xff]   ;;  %v1327_v9 = vld [vmem:[#allocation5 + $0x10] sm:$0xff]   ;;  %s269_s6 = scalar_lea.vmem [#allocation8], %s1076_s15  ;;  %s1785_s8 = scalar_lea.hbm %s1834_s5, %s1138_s28 }
  0x6c   : > { %v1321_v3 = vld [vmem:[#allocation5 + $0x80] sm:$0xff]   ;;  %1163 = vmatprep.subr.bf16.mxu1 %v1320_v2  ;;  %1143 = vmatprep.subr.bf16.mxu0 %v1322_v4  ;;  %v1325_v7 = vld [vmem:[#allocation5 + $0x88] sm:$0xff]   ;;  %v1328_v10 = vld [vmem:[#allocation5 + $0xd0] sm:$0xff]   ;;  %s978_s16 = sshll.u32 %s269_s6, 4  ;;  %s965_s10 = scalar_lea.sflag [#allocation4], %s1740_s12  ;;  %s1787_s16 = int_to_ptr.vmem [resolvable:$true] %s978_s16 }
  0x6d   : > { %1164 = vmatpush3.bf16.msra.mxu1 %v1321_v3  ;;  %v1329_v11 = vld [vmem:[#allocation5 + $0x90] sm:$0xff]   ;;  %v1330_v12 = vld [vmem:[#allocation5 + $0x58] sm:$0xff]   ;;  %v1334_v16 = vld [vmem:[#allocation5 + $0x60] sm:$0xff]   ;;  %s1461_s13 = scalar_lea.vmem %s1787_s16, 64  ;;  %p1848_p0 = scmp.ne.s32.totalorder %s1843_s23, 0 }
  0x6e   : > { %1165 = vmatprep.subr.bf16.mxu1 %v1324_v6  ;;  %v1331_v13 = vld [vmem:[#allocation5 + $0x18] sm:$0xff]   ;;  %v1335_v17 = vld [vmem:[#allocation5 + $0x20] sm:$0xff]   ;;  %v1338_v20 = vld [vmem:[#allocation5 + $0x68] sm:$0xff]   ;;  %p1462_p11 = scmp.ne.s32.totalorder %s1787_s16, %s1461_s13  ;;  %s1540_s22 = smov [#allocation8]  }
  0x6f   : > { %1144 = vmatpush3.bf16.msra.mxu0 %v1323_v5  ;;  %v1332_v14 = vld [vmem:[#allocation5 + $0xd8] sm:$0xff]   ;;  %v1336_v18 = vld [vmem:[#allocation5 + $0xe0] sm:$0xff]   ;;  %v1339_v21 = vld [vmem:[#allocation5 + $0x28] sm:$0xff]   ;;  %s1465_s29 = sshll.u32 %s1540_s22, 4  ;;  %s1466_s29 = int_to_ptr.vmem [resolvable:$false] %s1465_s29 }
  0x70   : > { %1145 = vmatprep.subr.bf16.mxu0 %v1326_v8  ;;  %v1333_v15 = vld [vmem:[#allocation5 + $0x98] sm:$0xff]   ;;  %v1337_v19 = vld [vmem:[#allocation5 + $0xa0] sm:$0xff]   ;;  %v1340_v22 = vld [vmem:[#allocation5 + $0xe8] sm:$0xff]   ;;  %p1463_p1 = pnand %p1462_p11, %p1848_p0  ;;  %p1468_p7 = scmp.lt.s32.totalorder %s1787_s16, %s1466_s29 }
  0x71   : > { %1166 = vmatpush3.bf16.msra.mxu1 %v1325_v7  ;;  %v1341_v23 = vld [vmem:[#allocation5 + $0xa8] sm:$0xff]   ;;  %v1342_v24 = vld [vmem:[#allocation5 + $0x70] sm:$0xff]   ;;  %v1346_v28 = vld [vmem:[#allocation5 + $0x78] sm:$0xff]  }
  0x72   : > { %1167 = vmatprep.subr.bf16.mxu1 %v1328_v10  ;;  %v1343_v25 = vld [vmem:[#allocation5 + $0x30] sm:$0xff]   ;;  %v1347_v29 = vld [vmem:[#allocation5 + $0x38] sm:$0xff]   ;;  %v1350_v36 = vld [vmem:[#allocation5 + $0x140] sm:$0xff]   ;;  %p1464_p3 = pneg %p1463_p1 }
  0x73   : > { %1146 = vmatpush3.bf16.msra.mxu0 %v1327_v9  ;;  %v1344_v26 = vld [vmem:[#allocation5 + $0xf0] sm:$0xff]   ;;  %v1348_v30 = vld [vmem:[#allocation5 + $0xf8] sm:$0xff]   ;;  %v274_v37 = vld [vmem:[%s1744_s17 + $0x18] sm:$0xff] }
  0x74   : > { %1147 = vmatprep.subr.bf16.mxu0 %v1330_v12  ;;  %v1345_v27 = vld [vmem:[#allocation5 + $0xb0] sm:$0xff]   ;;  %v1349_v33 = vld [vmem:[#allocation5 + $0xb8] sm:$0xff]   ;;  %v281_v38 = vpack.c.bf16 %v274_v37, %v274_v37  ;;  %v1351_v39 = vld [vmem:[#allocation5 + $0x100] sm:$0xff]  }
  0x75   : > { %1168 = vmatpush3.bf16.msra.mxu1 %v1329_v11  ;;  %v272_v31 = vld [vmem:[%s1744_s17 + $0x8] sm:$0xff]  ;;  %v271_v34 = vld [vmem:[%s1744_s17] sm:$0xff]  ;;  %v273_v40 = vld [vmem:[%s1744_s17 + $0x10] sm:$0xff] }
  0x76   : > { %1169 = vmatprep.subr.bf16.mxu1 %v1332_v14  ;;  %v279_v32 = vpack.c.bf16 %v272_v31, %v272_v31  ;;  %v278_v35 = vpack.c.bf16 %v271_v34, %v271_v34  ;;  %760 = vmatprep.mubr.bf16.mxu1 %v281_v38  ;;  %v280_v41 = vpack.c.bf16 %v273_v40, %v273_v40  ;;  %v1352_v42 = vld [vmem:[#allocation5 + $0x148] sm:$0xff]   ;;  %v1354_v45 = vld [vmem:[#allocation5 + $0x150] sm:$0xff]   ;;  %v1356_v47 = vld [vmem:[#allocation5 + $0x158] sm:$0xff]  }
  0x77   : > { %1148 = vmatpush3.bf16.msra.mxu0 %v1331_v13  ;;  %v1353_v43 = vld [vmem:[#allocation5 + $0x108] sm:$0xff]   ;;  %v1355_v46 = vld [vmem:[#allocation5 + $0x110] sm:$0xff]   ;;  %v1357_v48 = vld [vmem:[#allocation5 + $0x118] sm:$0xff]  }
  0x78   : > { %1149 = vmatprep.subr.bf16.mxu0 %v1334_v16  ;;  %720 = vmatprep.mubr.bf16.mxu0 %v279_v32  ;;  %v1358_v49 = vld [vmem:[#allocation5 + $0x160] sm:$0xff]   ;;  %v1360_v51 = vld [vmem:[#allocation5 + $0x168] sm:$0xff]   ;;  %v276_v54 = vld [vmem:[%s1744_s17 + $0x28] sm:$0xff] }
  0x79   : > { %1170 = vmatpush3.bf16.msra.mxu1 %v1333_v15  ;;  %v1359_v50 = vld [vmem:[#allocation5 + $0x120] sm:$0xff]   ;;  %v1361_v52 = vld [vmem:[#allocation5 + $0x128] sm:$0xff]   ;;  %v1362_v55 = vld [vmem:[#allocation5 + $0x170] sm:$0xff]   ;;  %v283_v56 = vpack.c.bf16 %v276_v54, %v276_v54 }
  0x7a   : > { %1171 = vmatprep.subr.bf16.mxu1 %v1336_v18  ;;  %v1366_v53 = vld [vmem:[#allocation5 + $0x180] sm:$0xff]   ;;  %v1363_v59 = vld [vmem:[#allocation5 + $0x130] sm:$0xff]   ;;  %v1364_v60 = vld [vmem:[#allocation5 + $0x178] sm:$0xff]  }
  0x7b   : > { %1150 = vmatpush3.bf16.msra.mxu0 %v1335_v17  ;;  %v277_v57 = vld [vmem:[%s1744_s17 + $0x30] sm:$0xff]  ;;  %v275_v62 = vld [vmem:[%s1744_s17 + $0x20] sm:$0xff]  ;;  %s1467_s17 = scalar_lea.vmem %s1466_s29, 128 }
  0x7c   : > { %1151 = vmatprep.subr.bf16.mxu0 %v1338_v20  ;;  %v284_v58 = vpack.c.bf16 %v277_v57, %v277_v57  ;;  %v1365_v61 = vld [vmem:[#allocation5 + $0x138] sm:$0xff]   ;;  %v282_v63 = vpack.c.bf16 %v275_v62, %v275_v62  ;;  %v1367_v0 = vld [vmem:[#allocation7] sm:$0xff]   ;;  %v1368_v1 = vld [vmem:[#allocation7 + $0x8] sm:$0xff]   ;;  %p1469_p9 = scmp.lt.s32.totalorder %s1467_s17, %s1461_s13 }
  0x7d   : > { %1172 = vmatpush3.bf16.msra.mxu1 %v1337_v19  ;;  %v1369_v2 = vld [vmem:[#allocation7 + $0x10] sm:$0xff]   ;;  %v1370_v3 = vld [vmem:[#allocation7 + $0x18] sm:$0xff]   ;;  %v1371_v4 = vld [vmem:[#allocation7 + $0x20] sm:$0xff]  }
  0x7e   : > { %1173 = vmatprep.subr.bf16.mxu1 %v1340_v22  ;;  %v1372_v5 = vld [vmem:[#allocation7 + $0x28] sm:$0xff]   ;;  %v1373_v6 = vld [vmem:[#allocation7 + $0x30] sm:$0xff]   ;;  %v1374_v7 = vld [vmem:[#allocation7 + $0x38] sm:$0xff]   ;;  %p1470_p12 = por %p1469_p9, %p1468_p7 }
  0x7f   : > { %1152 = vmatpush3.bf16.msra.mxu0 %v1339_v21  ;;  %v1077_v9 = vld [vmem:[%s1831_s2] ss:$0 sm:$0xff] }
  0x80   : > { %1153 = vmatprep.subr.bf16.mxu0 %v1342_v24  ;;  %v1128_v34 = vld [vmem:[%s1833_s4] ss:$0 sm:$0xff]  ;;  %p1471_p2 = pnand %p1470_p12, %p1464_p3 }
  0x81   : > { %1174 = vmatpush3.bf16.msra.mxu1 %v1341_v23 }
  0x82   : > { %1175 = vmatprep.subr.bf16.mxu1 %v1344_v26 }
  0x83   : > { %1154 = vmatpush3.bf16.msra.mxu0 %v1343_v25 }
  0x84   : > { %1155 = vmatprep.subr.bf16.mxu0 %v1346_v28 }
  0x85   : > { %1176 = vmatpush3.bf16.msra.mxu1 %v1345_v27 }
  0x86   : > { %1177 = vmatprep.subr.bf16.mxu1 %v1348_v30 }
  0x87   : > { %1156 = vmatpush3.bf16.msra.mxu0 %v1347_v29 }
  0x88   : > { %1185 = vmatprep.subr.bf16.mxu0 %v1350_v36 }
  0x89   : > { %1178 = vmatpush3.bf16.msra.mxu1 %v1349_v33 }
  0x8a   : > { %721 = vmatmul.mubr.bf16.vlgmr.msra.gmra.mrb[0].mxu0 %v278_v35  ;;  %1218 = vmatprep.subr.bf16.mxu1 %v1538_v44 }
  0x8b   : > { %1186 = vmatpush3.bf16.msra.mxu0 %v1351_v39  ;;  %800 = vmatprep.mubr.bf16.mxu0 %v283_v56 }
  0x8c   : > { %761 = vmatmul.mubr.bf16.vlgmr.msra.gmra.mrb[0].mxu1 %v280_v41  ;;  %1187 = vmatprep.subr.bf16.mxu0 %v1352_v42 }
  0x8d   : > { %1220 = vmatprep.mubr.msk.bf16.mxu1 %vm1539_vm0, %v1538_v44  ;;  %1219 = vmatpush3.bf16.msra.mxu1 %v1366_v53 }
  0x8e   : > { %1224 = vmatprep.subr.bf16.mxu1 %v1538_v44 }
  0x8f   : > { %1188 = vmatpush3.bf16.msra.mxu0 %v1353_v43 }
  0x90   : > { %1189 = vmatprep.subr.bf16.mxu0 %v1354_v45 }
  0x93   : > { %1190 = vmatpush3.bf16.msra.mxu0 %v1355_v46 }
  0x94   : > { %1191 = vmatprep.subr.bf16.mxu0 %v1356_v47  ;;  %1221 = vmatmul.mubr.msk.bf16.vlgmr.msra.gmra.mrb[4].mxu1 %vm684_vm1, %v284_v58 }
  0x95   : > { %1240 = vmatprep.mubr.msk.bf16.mxu1 %vm1539_vm0, %v1538_v44  ;;  %1225 = vmatpush3.bf16.msra.mxu1 %v1367_v0 }
  0x96   : > { %1226 = vmatprep.subr.bf16.mxu1 %v1538_v44 }
  0x97   : > { %1192 = vmatpush3.bf16.msra.mxu0 %v1357_v48 }
  0x98   : > { %1193 = vmatprep.subr.bf16.mxu0 %v1358_v49 }
  0x99   : > { %1227 = vmatpush3.bf16.msra.mxu1 %v1368_v1 }
  0x9a   : > { %1228 = vmatprep.subr.bf16.mxu1 %v1538_v44 }
  0x9b   : > { %1194 = vmatpush3.bf16.msra.mxu0 %v1359_v50 }
  0x9c   : > { %1195 = vmatprep.subr.bf16.mxu0 %v1360_v51 }
  0x9d   : > { %1229 = vmatpush3.bf16.msra.mxu1 %v1369_v2 }
  0x9e   : > { %1230 = vmatprep.subr.bf16.mxu1 %v1538_v44 }
  0x9f   : > { %1196 = vmatpush3.bf16.msra.mxu0 %v1361_v52 }
  0xa0   : > { %1197 = vmatprep.subr.bf16.mxu0 %v1362_v55 }
  0xa1   : > { %1231 = vmatpush3.bf16.msra.mxu1 %v1370_v3 }
  0xa2   : > { %1232 = vmatprep.subr.bf16.mxu1 %v1538_v44 }
  0xa3   : > { %1198 = vmatpush3.bf16.msra.mxu0 %v1363_v59 }
  0xa4   : > { %1199 = vmatprep.subr.bf16.mxu0 %v1364_v60 }
  0xa5   : > { %1233 = vmatpush3.bf16.msra.mxu1 %v1371_v4 }
  0xa6   : > { %1234 = vmatprep.subr.bf16.mxu1 %v1538_v44 }
  0xa7   : > { %1200 = vmatpush3.bf16.msra.mxu0 %v1365_v61 }
  0xa9   : > { %1235 = vmatpush3.bf16.msra.mxu1 %v1372_v5 }
  0xaa   : > { %801 = vmatmul.mubr.bf16.vlgmr.msra.gmra.mrb[4].mxu0 %v282_v63  ;;  %1236 = vmatprep.subr.bf16.mxu1 %v1538_v44 }
  0xad   : > { %1237 = vmatpush3.bf16.msra.mxu1 %v1373_v6 }
  0xae   : > { %1238 = vmatprep.subr.bf16.mxu1 %v1538_v44 }
  0xb1   : > { %1239 = vmatpush3.bf16.msra.mxu1 %v1374_v7 }
 0x15d   : > { %v1157_v8 = vpop.f32.mrb[0].mxu0 }
 0x15e   : > { %v1158_v10 = vpop.f32.mrb[1].mxu0 }
 0x15f   : > { %v1159_v11 = vadd.f32 %v1158_v10, %v1157_v8  ;;  %v1160_v12 = vpop.f32.mrb[2].mxu0  ;;  %v1179_v13 = vpop.f32.mrb[0].mxu1 }
 0x160   : > { %v1161_v14 = vpop.f32.mrb[3].mxu0  ;;  %v1180_v16 = vpop.f32.mrb[1].mxu1 }
 0x161   : > { %v723_v15 = vadd.f32 %v1159_v11, %v1077_v9  ;;  %v1181_v17 = vadd.f32 %v1180_v16, %v1179_v13  ;;  %v1182_v18 = vpop.f32.mrb[2].mxu1 }
 0x162   : > { %v1183_v19 = vpop.f32.mrb[3].mxu1 }
 0x163   : > { %v763_v20 = vadd.f32 %v1181_v17, %v723_v15 }
 0x167   : > { %v842_v21 = vpop.f32.mrb[4].mxu1 }
 0x168   : > { %v1222_v22 = vpop.f32.mrb[5].mxu1 }
 0x169   : > { %v845_v23 = vpop.f32.mrb[6].mxu1 }
 0x16a   : > { %v1223_v24 = vpop.f32.mrb[7].mxu1 }
 0x17d   : > { %v1201_v25 = vpop.f32.mrb[4].mxu0 }
 0x17e   : > { %v1202_v26 = vpop.f32.mrb[5].mxu0 }
 0x17f   : > { %v1203_v27 = vadd.f32 %v1202_v26, %v1201_v25  ;;  %v1204_v28 = vpop.f32.mrb[6].mxu0 }
 0x180   : > { %v1205_v29 = vpop.f32.mrb[7].mxu0 }
 0x181   : > { %v803_v30 = vadd.f32 %v1203_v27, %v763_v20 }
 0x183   : > { %v843_v31 = vadd.f32 %v842_v21, %v803_v30 }
 0x185   : > { %v848_v32 = vmax.f32 %v843_v31, 0.0 }
 0x187   : > { %v849_v33 = vpack.c.bf16 %v848_v32, %v848_v32 }
 0x189   : > { %1241 = vmatmul.mubr.bf16.vlgmr.msra.gmra.mrb[8].mxu1 %v849_v33 }
 0x25c   : > { %v955_v35 = vpop.f32.mrb[8].mxu1 }
 0x25d   : > { %v956_v36 = vadd.f32 %v1128_v34, %v955_v35  ;;  %v1242_v37 = vpop.f32.mrb[9].mxu1 }
 0x25e   : > { %v958_v38 = vpop.f32.mrb[10].mxu1 }
 0x25f   : > { %v961_v39 = vmax.f32 %v956_v36, 0.0  ;;  %v1243_v40 = vpop.f32.mrb[11].mxu1 }
 0x261   : > { %v962_v41 = vpack.c.bf16 %v961_v39, %v961_v39 }
 0x263   : > { %963 = vst [vmem:[%s269_s6] sm:$0xf] %v962_v41 }
 0x264   : > { %1474 = shalt.err (!%p1471_p2)
}
 0x265   : > { %s1475_s12 = scalar_lea.hbm %s1785_s8, 64  ;;  %s1479_s15 = scalar_lea.hbm %s1834_s5, 128 }
 0x266   : > { %p1476_p13 = scmp.ne.s32.totalorder %s1785_s8, %s1475_s12  ;;  %p1480_p4 = scmp.lt.u32.totalorder %s1785_s8, %s1834_s5 }
 0x267   : > { %p1481_p5 = scmp.lt.u32.totalorder %s1479_s15, %s1475_s12  ;;  %p1483_p11 = scmp.lt.u32.totalorder %s1475_s12, %s1785_s8 }
 0x268   : > { %p1477_p6 = pnand %p1476_p13, %p1848_p0 }
 0x269   : > { %p1482_p8 = por %p1481_p5, %p1480_p4 }
 0x26a   : > { %p1478_p10 = pneg %p1477_p6 }
 0x26b   : > { %p1484_p1 = por %p1483_p11, %p1482_p8 }
 0x26d   : > { %p1485_p3 = pnand %p1484_p1, %p1478_p10 }
 0x26f   : > { %1488 = shalt.err (!%p1485_p3)
}
 0x270   : > { %1257 = dma.vmem_to_hbm [thread:$0]  (%p1848_p0), %s1787_s16, 64, %s1785_s8, %s965_s10  }
 0x271 PF: > { %s990_s28 = sand.u32 1, %s1519_s18   ;;  %p1849_p7 = scmp.ne.s32.totalorder %s1839_s25, 0 }
 0x272   : > { %p1850_p9 = scmp.ge.s32.totalorder %s1531_s21, 2  ;;  %s991_s6 = scalar_lea.sflag [#allocation4], %s990_s28 }
 0x274   : > { %p1271_p12 = pnand %p1850_p9, %p1849_p7 }
 0x276   : > { %1514 = dma.done.wait (!%p1271_p12), %s991_s6, 64  }
 0x277   : > { %1516 = vsyncadd (!%p1271_p12), %s991_s6, 4294967232  ;;  %p19_p2 = scmp.ge.s32.totalorder %s1681_s14, 4   ;;  %s1851_s18 = smov %s1523_s19 }
 0x278   : > { %s1852_s19 = smov %s1527_s20  ;;  %s1853_s20 = smov %s1697_s27 }
 0x279   : > { %s1854_s21 = smov %s1681_s14  ;;  %21 = sbr.rel (!%p19_p2) target bundleno = 6 (0x6), region = 93 }
 0x280   :  { %996 = vsyncpa [#allocation3], 1 }
 0x281   :  { %998 = vsyncpa [#allocation3 + $0x1], 1 }
 0x282   :  { %999 = vsyncpa [#allocation6], 1 }
 0x283   :  { %1000 = vsyncpa [#allocation4], 1 }
 0x284   :  { %1002 = vsyncpa [#allocation4 + $0x1], 1 }

</bundles_post_ra>
